<compile_context>
chip_gen: v6e
topology: v6e:2x2x1
jax: 0.10.0
libtpu: 0.0.40
codegen_flags: <defaults>
</compile_context>

<pallas_src>
import functools

import jax
import jax.numpy as jnp
from jax.experimental import pallas as pl
from jax.experimental.pallas import tpu as pltpu


def _rgcn2_kernel(x_ref, a1_ref, a2_ref, w11_ref, w12_ref, w21_ref, w22_ref,
                  o_ref):
    """Fused two-layer relational GCN for one graph (one grid step).

    x_ref        : (N, d_in)   node features (compute dtype)
    a1_ref/a2_ref: (N, N)      normalized adjacencies for relations 1/2
    w11/w12      : (d_in, h1)  layer-1 per-relation weights
    w21/w22      : (h1, h2)    layer-2 per-relation weights
    o_ref        : (N, h2)     output (f32)
    """
    x = x_ref[...]
    a1 = a1_ref[...]
    a2 = a2_ref[...]
    cdt = x.dtype  # MXU operand dtype (f32 or bf16); accumulation is f32.

    # ---------------- layer 1 ----------------
    xw1_r1 = jnp.dot(x, w11_ref[...],
                     preferred_element_type=jnp.float32).astype(cdt)
    xw1_r2 = jnp.dot(x, w12_ref[...],
                     preferred_element_type=jnp.float32).astype(cdt)
    # Aggregation + relation sum + ReLU on the f32 accumulator (VPU stays f32).
    h1 = jnp.maximum(
        jnp.dot(a1, xw1_r1, preferred_element_type=jnp.float32)
        + jnp.dot(a2, xw1_r2, preferred_element_type=jnp.float32), 0.0)
    h1c = h1.astype(cdt)

    # ---------------- layer 2 ----------------
    hw2_r1 = jnp.dot(h1c, w21_ref[...],
                     preferred_element_type=jnp.float32).astype(cdt)
    hw2_r2 = jnp.dot(h1c, w22_ref[...],
                     preferred_element_type=jnp.float32).astype(cdt)
    out = jnp.maximum(
        jnp.dot(a1, hw2_r1, preferred_element_type=jnp.float32)
        + jnp.dot(a2, hw2_r2, preferred_element_type=jnp.float32), 0.0)
    o_ref[...] = out.astype(o_ref.dtype)


def rgcn2_forward(features, adj_1, adj_2, params, *,
                  compute_dtype=jnp.bfloat16):
    """Batched RGCN2 forward (inference).

    features : (B, N, d_in)
    adj_1/2  : (B, N, N)   per-graph normalized adjacencies
    params   : dict with w1_r1 (d_in,h1), w1_r2 (d_in,h1),
                         w2_r1 (h1,h2),  w2_r2 (h1,h2)
    Returns  : (B, N, h2) float32

    B = 1 reproduces the single-graph PyTorch module exactly.
    In a real model the bf16 copies of X / A would be cached per graph; the
    casts here are cheap no-ops when compute_dtype == float32.
    """
    b, n, d_in = features.shape
    h1 = params["w1_r1"].shape[1]
    h2 = params["w2_r1"].shape[1]

    x = features.astype(compute_dtype)
    a1 = adj_1.astype(compute_dtype)
    a2 = adj_2.astype(compute_dtype)
    w11 = params["w1_r1"].astype(compute_dtype)
    w12 = params["w1_r2"].astype(compute_dtype)
    w21 = params["w2_r1"].astype(compute_dtype)
    w22 = params["w2_r2"].astype(compute_dtype)

    # Advisory cost estimate so XLA treats this as a cheap op and overlaps
    # surrounding work with the (launch-latency dominated) custom call.
    flops_per_graph = (2 * (2 * n * d_in * h1) + 2 * (2 * n * n * h1)
                       + 2 * (2 * n * h1 * h2) + 2 * (2 * n * n * h2))
    itemsize = jnp.dtype(compute_dtype).itemsize
    bytes_per_graph = (n * d_in + 2 * n * n) * itemsize + n * h2 * 4
    weight_bytes = (2 * d_in * h1 + 2 * h1 * h2) * itemsize
    cost = pl.CostEstimate(flops=b * flops_per_graph,
                           transcendentals=0,
                           bytes_accessed=b * bytes_per_graph + weight_bytes)

    return pl.pallas_call(
        _rgcn2_kernel,
        out_shape=jax.ShapeDtypeStruct((b, n, h2), jnp.float32),
        grid=(b,),  # one graph per step; batch axis is megacore-parallel.
        in_specs=[
            pl.BlockSpec((None, n, d_in), lambda i: (i, 0, 0)),  # X_i
            pl.BlockSpec((None, n, n), lambda i: (i, 0, 0)),     # A1_i
            pl.BlockSpec((None, n, n), lambda i: (i, 0, 0)),     # A2_i
            pl.BlockSpec((d_in, h1), lambda i: (0, 0)),          # W1 rel 1
            pl.BlockSpec((d_in, h1), lambda i: (0, 0)),          # W1 rel 2
            pl.BlockSpec((h1, h2), lambda i: (0, 0)),            # W2 rel 1
            pl.BlockSpec((h1, h2), lambda i: (0, 0)),            # W2 rel 2
        ],
        out_specs=pl.BlockSpec((None, n, h2), lambda i: (i, 0, 0)),
        compiler_params=pltpu.CompilerParams(
            dimension_semantics=("parallel",),
            # Per-step working set is ~100 KiB; 16 MiB leaves ample headroom
            # even against v7x's 64 MiB/TC physical VMEM.
            vmem_limit_bytes=16 * 1024 * 1024,
        ),
        cost_estimate=cost,
    )(x, a1, a2, w11, w12, w21, w22)


def _glorot(key, shape):
    fan_in, fan_out = shape
    limit = jnp.sqrt(6.0 / (fan_in + fan_out))
    return jax.random.uniform(key, shape, jnp.float32, -limit, limit)


def _make_norm_adj(key, n):
    """Deterministic dense 'normalized adjacency'-like matrix."""
    a = (jax.random.uniform(key, (n, n)) < 0.2).astype(jnp.float32)
    a = a + jnp.eye(n, dtype=jnp.float32)          # self loops
    a = 0.5 * (a + a.T)                            # symmetrize
    deg = jnp.sum(a, axis=1, keepdims=True)
    d_inv_sqrt = 1.0 / jnp.sqrt(jnp.maximum(deg, 1e-6))
    return d_inv_sqrt * a * d_inv_sqrt.T           # D^-1/2 A D^-1/2


def _reference_single(features, adj_1, adj_2, params):
    h1 = jax.nn.relu(adj_1 @ (features @ params["w1_r1"])
                     + adj_2 @ (features @ params["w1_r2"]))
    return jax.nn.relu(adj_1 @ (h1 @ params["w2_r1"])
                       + adj_2 @ (h1 @ params["w2_r2"]))


if __name__ == "__main__":
    # Shapes consistent with the module:
    #   num_features (input_dim) = 32, FLAGS.hidden1 = 32, FLAGS.hidden2 = 16
    B = 4             # batch of graphs (amortizes launch; uses both v7x TCs)
    N = 64            # number of graph nodes
    NUM_FEATURES = 32
    HIDDEN1 = 32
    HIDDEN2 = 16

    key = jax.random.PRNGKey(0)
    k_feat, k_adj, k_w1a, k_w1b, k_w2a, k_w2b = jax.random.split(key, 6)

    features = jax.random.normal(k_feat, (B, N, NUM_FEATURES), jnp.float32)
    adj_keys = jax.random.split(k_adj, 2 * B)
    adj_1 = jnp.stack([_make_norm_adj(adj_keys[i], N) for i in range(B)])
    adj_2 = jnp.stack([_make_norm_adj(adj_keys[B + i], N) for i in range(B)])

    params = {
        "w1_r1": _glorot(k_w1a, (NUM_FEATURES, HIDDEN1)),
        "w1_r2": _glorot(k_w1b, (NUM_FEATURES, HIDDEN1)),
        "w2_r1": _glorot(k_w2a, (HIDDEN1, HIDDEN2)),
        "w2_r2": _glorot(k_w2b, (HIDDEN1, HIDDEN2)),
    }

    ref = jax.vmap(lambda f, a, b_: _reference_single(f, a, b_, params))(
        features, adj_1, adj_2)

    # f32 compute path: tight numerical check against the pure-JAX reference.
    fwd_f32 = jax.jit(functools.partial(rgcn2_forward,
                                        compute_dtype=jnp.float32))
    out = jax.block_until_ready(fwd_f32(features, adj_1, adj_2, params))
    assert out.shape == (B, N, HIDDEN2), out.shape
    assert jnp.allclose(out, ref, atol=1e-4, rtol=1e-4), "f32 mismatch vs ref"

    # Default bf16 MXU path (f32 accumulation): loose check (~8-bit mantissa).
    fwd_bf16 = jax.jit(rgcn2_forward)
    out_bf16 = jax.block_until_ready(fwd_bf16(features, adj_1, adj_2, params))
    assert out_bf16.shape == (B, N, HIDDEN2), out_bf16.shape
    assert jnp.allclose(out_bf16, ref, atol=1e-1, rtol=1e-1), \
        "bf16 mismatch vs ref"

    print("KERNEL_OK")
</pallas_src>

<mosaic_0001>
module attributes {stable_mosaic.version = 11 : i64} {
  func.func @_rgcn2_kernel(%arg0: i32, %arg1: memref<1x64x32xf32, #tpu.memory_space<vmem>>, %arg2: memref<1x64x64xf32, #tpu.memory_space<vmem>>, %arg3: memref<1x64x64xf32, #tpu.memory_space<vmem>>, %arg4: memref<32x32xf32, #tpu.memory_space<vmem>>, %arg5: memref<32x32xf32, #tpu.memory_space<vmem>>, %arg6: memref<32x16xf32, #tpu.memory_space<vmem>>, %arg7: memref<32x16xf32, #tpu.memory_space<vmem>>, %arg8: memref<1x64x16xf32, #tpu.memory_space<vmem>>) attributes {dimension_semantics = [#tpu.dimension_semantics<parallel>], iteration_bounds = array<i64: 4>, scalar_prefetch = 0 : i64, scratch_operands = 0 : i64, tpu.core_type = #tpu.core_type<tc>, window_params = [{transform_indices = @transform_0, window_bounds = array<i64: 1, 64, 32>}, {transform_indices = @transform_1, window_bounds = array<i64: 1, 64, 64>}, {transform_indices = @transform_2, window_bounds = array<i64: 1, 64, 64>}, {pipeline_mode = #tpu.pipeline_mode<synchronous>, transform_indices = @transform_3, window_bounds = array<i64: 32, 32>}, {pipeline_mode = #tpu.pipeline_mode<synchronous>, transform_indices = @transform_4, window_bounds = array<i64: 32, 32>}, {pipeline_mode = #tpu.pipeline_mode<synchronous>, transform_indices = @transform_5, window_bounds = array<i64: 32, 16>}, {pipeline_mode = #tpu.pipeline_mode<synchronous>, transform_indices = @transform_6, window_bounds = array<i64: 32, 16>}, {transform_indices = @transform_7, window_bounds = array<i64: 1, 64, 16>}]} {
    %c0 = arith.constant 0 : index
    %c0_0 = arith.constant 0 : index
    %c0_1 = arith.constant 0 : index
    %0 = vector.load %arg1[%c0, %c0_0, %c0_1] : memref<1x64x32xf32, #tpu.memory_space<vmem>>, vector<1x64x32xf32>
    %1 = vector.shape_cast %0 : vector<1x64x32xf32> to vector<64x32xf32>
    %c0_2 = arith.constant 0 : index
    %c0_3 = arith.constant 0 : index
    %c0_4 = arith.constant 0 : index
    %2 = vector.load %arg2[%c0_2, %c0_3, %c0_4] : memref<1x64x64xf32, #tpu.memory_space<vmem>>, vector<1x64x64xf32>
    %3 = vector.shape_cast %2 : vector<1x64x64xf32> to vector<64x64xf32>
    %c0_5 = arith.constant 0 : index
    %c0_6 = arith.constant 0 : index
    %c0_7 = arith.constant 0 : index
    %4 = vector.load %arg3[%c0_5, %c0_6, %c0_7] : memref<1x64x64xf32, #tpu.memory_space<vmem>>, vector<1x64x64xf32>
    %5 = vector.shape_cast %4 : vector<1x64x64xf32> to vector<64x64xf32>
    %c0_8 = arith.constant 0 : index
    %c0_9 = arith.constant 0 : index
    %6 = vector.load %arg4[%c0_8, %c0_9] : memref<32x32xf32, #tpu.memory_space<vmem>>, vector<32x32xf32>
    %cst = arith.constant dense<0.000000e+00> : vector<64x32xf32>
    %7 = tpu.matmul %1, %6, %cst {dimension_numbers = #tpu.dot_dimension_numbers<[1], [0], [0], [1], [0, 0, 1, 1], [], []>} : vector<64x32xf32>, vector<32x32xf32>, vector<64x32xf32> -> vector<64x32xf32>
    %c0_10 = arith.constant 0 : index
    %c0_11 = arith.constant 0 : index
    %8 = vector.load %arg5[%c0_10, %c0_11] : memref<32x32xf32, #tpu.memory_space<vmem>>, vector<32x32xf32>
    %cst_12 = arith.constant dense<0.000000e+00> : vector<64x32xf32>
    %9 = tpu.matmul %1, %8, %cst_12 {dimension_numbers = #tpu.dot_dimension_numbers<[1], [0], [0], [1], [0, 0, 1, 1], [], []>} : vector<64x32xf32>, vector<32x32xf32>, vector<64x32xf32> -> vector<64x32xf32>
    %cst_13 = arith.constant dense<0.000000e+00> : vector<64x32xf32>
    %10 = tpu.matmul %3, %7, %cst_13 {dimension_numbers = #tpu.dot_dimension_numbers<[1], [0], [0], [1], [0, 0, 1, 1], [], []>} : vector<64x64xf32>, vector<64x32xf32>, vector<64x32xf32> -> vector<64x32xf32>
    %cst_14 = arith.constant dense<0.000000e+00> : vector<64x32xf32>
    %11 = tpu.matmul %5, %9, %cst_14 {dimension_numbers = #tpu.dot_dimension_numbers<[1], [0], [0], [1], [0, 0, 1, 1], [], []>} : vector<64x64xf32>, vector<64x32xf32>, vector<64x32xf32> -> vector<64x32xf32>
    %12 = arith.addf %10, %11 : vector<64x32xf32>
    %cst_15 = arith.constant 0.000000e+00 : f32
    %13 = vector.broadcast %cst_15 : f32 to vector<64x32xf32>
    %14 = arith.maximumf %12, %13 : vector<64x32xf32>
    %c0_16 = arith.constant 0 : index
    %c0_17 = arith.constant 0 : index
    %15 = vector.load %arg6[%c0_16, %c0_17] : memref<32x16xf32, #tpu.memory_space<vmem>>, vector<32x16xf32>
    %cst_18 = arith.constant dense<0.000000e+00> : vector<64x16xf32>
    %16 = tpu.matmul %14, %15, %cst_18 {dimension_numbers = #tpu.dot_dimension_numbers<[1], [0], [0], [1], [0, 0, 1, 1], [], []>} : vector<64x32xf32>, vector<32x16xf32>, vector<64x16xf32> -> vector<64x16xf32>
    %c0_19 = arith.constant 0 : index
    %c0_20 = arith.constant 0 : index
    %17 = vector.load %arg7[%c0_19, %c0_20] : memref<32x16xf32, #tpu.memory_space<vmem>>, vector<32x16xf32>
    %cst_21 = arith.constant dense<0.000000e+00> : vector<64x16xf32>
    %18 = tpu.matmul %14, %17, %cst_21 {dimension_numbers = #tpu.dot_dimension_numbers<[1], [0], [0], [1], [0, 0, 1, 1], [], []>} : vector<64x32xf32>, vector<32x16xf32>, vector<64x16xf32> -> vector<64x16xf32>
    %cst_22 = arith.constant dense<0.000000e+00> : vector<64x16xf32>
    %19 = tpu.matmul %3, %16, %cst_22 {dimension_numbers = #tpu.dot_dimension_numbers<[1], [0], [0], [1], [0, 0, 1, 1], [], []>} : vector<64x64xf32>, vector<64x16xf32>, vector<64x16xf32> -> vector<64x16xf32>
    %cst_23 = arith.constant dense<0.000000e+00> : vector<64x16xf32>
    %20 = tpu.matmul %5, %18, %cst_23 {dimension_numbers = #tpu.dot_dimension_numbers<[1], [0], [0], [1], [0, 0, 1, 1], [], []>} : vector<64x64xf32>, vector<64x16xf32>, vector<64x16xf32> -> vector<64x16xf32>
    %21 = arith.addf %19, %20 : vector<64x16xf32>
    %cst_24 = arith.constant 0.000000e+00 : f32
    %22 = vector.broadcast %cst_24 : f32 to vector<64x16xf32>
    %23 = arith.maximumf %21, %22 : vector<64x16xf32>
    %c0_25 = arith.constant 0 : index
    %c0_26 = arith.constant 0 : index
    %c0_27 = arith.constant 0 : index
    %24 = vector.load %arg8[%c0_25, %c0_26, %c0_27] : memref<1x64x16xf32, #tpu.memory_space<vmem>>, vector<1x64x16xf32>
    %25 = vector.shape_cast %24 : vector<1x64x16xf32> to vector<64x16xf32>
    %26 = vector.shape_cast %23 : vector<64x16xf32> to vector<1x64x16xf32>
    tpu.vector_store %arg8[%c0_25, %c0_26, %c0_27], %26 {strides = array<i32>} : memref<1x64x16xf32, #tpu.memory_space<vmem>>, vector<1x64x16xf32>,
    return
  }
  func.func @transform_0(%arg0: i32) -> (i32, i32, i32) {
    %c0_i32 = arith.constant 0 : i32
    %c0_i32_0 = arith.constant 0 : i32
    %c0_i32_1 = arith.constant 0 : i32
    return %arg0, %c0_i32, %c0_i32_0 : i32, i32, i32
  }
  func.func @transform_1(%arg0: i32) -> (i32, i32, i32) {
    %c0_i32 = arith.constant 0 : i32
    %c0_i32_0 = arith.constant 0 : i32
    %c0_i32_1 = arith.constant 0 : i32
    return %arg0, %c0_i32, %c0_i32_0 : i32, i32, i32
  }
  func.func @transform_2(%arg0: i32) -> (i32, i32, i32) {
    %c0_i32 = arith.constant 0 : i32
    %c0_i32_0 = arith.constant 0 : i32
    %c0_i32_1 = arith.constant 0 : i32
    return %arg0, %c0_i32, %c0_i32_0 : i32, i32, i32
  }
  func.func @transform_3(%arg0: i32) -> (i32, i32) {
    %c0_i32 = arith.constant 0 : i32
    %c0_i32_0 = arith.constant 0 : i32
    %c0_i32_1 = arith.constant 0 : i32
    return %c0_i32, %c0_i32_0 : i32, i32
  }
  func.func @transform_4(%arg0: i32) -> (i32, i32) {
    %c0_i32 = arith.constant 0 : i32
    %c0_i32_0 = arith.constant 0 : i32
    %c0_i32_1 = arith.constant 0 : i32
    return %c0_i32, %c0_i32_0 : i32, i32
  }
  func.func @transform_5(%arg0: i32) -> (i32, i32) {
    %c0_i32 = arith.constant 0 : i32
    %c0_i32_0 = arith.constant 0 : i32
    %c0_i32_1 = arith.constant 0 : i32
    return %c0_i32, %c0_i32_0 : i32, i32
  }
  func.func @transform_6(%arg0: i32) -> (i32, i32) {
    %c0_i32 = arith.constant 0 : i32
    %c0_i32_0 = arith.constant 0 : i32
    %c0_i32_1 = arith.constant 0 : i32
    return %c0_i32, %c0_i32_0 : i32, i32
  }
  func.func @transform_7(%arg0: i32) -> (i32, i32, i32) {
    %c0_i32 = arith.constant 0 : i32
    %c0_i32_0 = arith.constant 0 : i32
    %c0_i32_1 = arith.constant 0 : i32
    return %arg0, %c0_i32, %c0_i32_0 : i32, i32, i32
  }
}

</mosaic_0001>

<bundles_post_ra>
// kernel: rgcn2_forward.1
= control target key start
LH: loop header
LB: loop body
LE: loop exit
PB: predicated region body
PF: predicated region fallthrough
CT: control target
= control target key end

     0   :  { %12 = vsyncpa [#allocation3], 0  ;;  %s2305_s0 = inlined_call_operand.vmem [shape: f32[4,64,32], index: 0, kind: input, shape index: {}]   ;;  %s2306_s1 = inlined_call_operand.vmem [shape: f32[4,64,64], index: 1, kind: input, shape index: {}]   ;;  %s2307_s2 = inlined_call_operand.hbm [shape: f32[4,64,64], index: 2, kind: input, shape index: {}]   ;;  %s2308_s3 = inlined_call_operand.vmem [shape: f32[32,32], index: 3, kind: input, shape index: {}]   ;;  %s2309_s4 = inlined_call_operand.vmem [shape: f32[32,32], index: 4, kind: input, shape index: {}]   ;;  %s2310_s5 = inlined_call_operand.vmem [shape: f32[32,16], index: 5, kind: input, shape index: {}]   ;;  %s2311_s6 = inlined_call_operand.vmem [shape: f32[32,16], index: 6, kind: input, shape index: {}]   ;;  %s2312_s7 = inlined_call_operand.vmem [shape: f32[4,64,16], index: 7, kind: output, shape index: {}]  }
   0x1   :  { %14 = vsyncpa [#allocation3 + $0x1], 0  ;;  %s1969_s24 = smov 0   ;;  %s1971_s25 = smov 0  }
   0x2   :  { %s1973_s26 = smov 0   ;;  %s1975_s27 = smov 0  }
   0x3 LB: > { %s1988_s28 = sadd.s32 4294967295, %s1924_s27   ;;  %s1991_s29 = sadd.s32 1, %s1924_s27   ;;  %s1924_s27 = sphi %s1975_s27, %s2321_s27   ;;  %s1920_s26 = sphi %s1973_s26, %s2320_s26   ;;  %s1916_s25 = sphi %s1971_s25, %s2319_s25   ;;  %s1912_s24 = sphi %s1969_s24, %s2318_s24  }
   0x4   : > { %s76_s30 = ssub.s32 %s1924_s27, %s1991_s29  ;;  %s79_s8 = sadd.s32 1, %s1920_s26 }
   0x5   : > { %p77_p0 = scmp.eq.s32.totalorder %s76_s30, 0  ;;  %p86_p1 = scmp.ne.s32.totalorder %s1920_s26, %s1916_s25 }
   0x6   : > { %p87_p2 = scmp.eq.s32.totalorder %s1924_s27, 0  ;;  %p92_p3 = scmp.ne.s32.totalorder %s1916_s25, %s1912_s24 }
   0x7   : > { %s2001_s9 = scalar_select %p77_p0, %s1920_s26, %s79_s8  }
   0x8   : > { %p88_p4 = por %p87_p2, %p86_p1  ;;  %p93_p5 = scmp.eq.s32.totalorder %s1988_s28, 0 }
   0x9   : > { %p1827_p6 = scmp.lt.s32.totalorder %s1924_s27, 4  ;;  %s254_s11 = sand.u32 1, %s1920_s26  }
   0xa   : > { %p2005_p7 = por %p93_p5, %p92_p3  ;;  %s1436_s12 = sshll.u32 %s254_s11, 6 }
   0xb   : > { %s1513_s13 = sshll.u32 %s1924_s27, 10  ;;  %s258_s17 = scalar_lea.vmem [#allocation2], %s1436_s12 }
   0xc   : > { %s2314_s10 = scalar_select %p2005_p7, 1, 0 }
   0xd   : > { %s2014_s16 = scalar_lea.hbm %s2307_s2, %s1513_s13  ;;  %s265_s18 = sshll.u32 %s258_s17, 4  ;;  %s2016_s18 = int_to_ptr.vmem [resolvable:$true] %s265_s18 }
   0xe   : > { %p2018_p8 = pnand %p1827_p6, %p88_p4  ;;  %s2023_s20 = scalar_lea.sflag [#allocation3], %s254_s11 }
   0xf   : > { %s1862_s21 = scalar_lea.hbm %s2014_s16, 1024  ;;  %s1867_s24 = scalar_lea.hbm %s2307_s2, 4096 }
  0x10   : > { %p1863_p10 = scmp.ne.s32.totalorder %s2014_s16, %s1862_s21  ;;  %p1864_p11 = pneg %p2018_p8 }
  0x11   : > { %p1868_p0 = scmp.lt.s32.totalorder %s2014_s16, %s2307_s2  ;;  %p1869_p1 = scmp.lt.s32.totalorder %s1867_s24, %s1862_s21 }
  0x12   : > { %p1865_p12 = pnand %p1864_p11, %p1863_p10 }
  0x13   : > { %p1870_p2 = por %p1869_p1, %p1868_p0 }
  0x14   : > { %p1866_p13 = pneg %p1865_p12 }
  0x16   : > { %p1871_p3 = pnand %p1870_p2, %p1866_p13 }
  0x18   : > { %1874 = shalt.err (!%p1871_p3)
}
  0x19   : > { %s1875_s11 = scalar_lea.vmem %s2016_s18, 1024  ;;  %s1926_s12 = smov [#allocation2]  }
  0x1a   : > { %p1876_p4 = scmp.ne.s32.totalorder %s2016_s18, %s1875_s11  ;;  %s1880_s13 = sshll.u32 %s1926_s12, 4  ;;  %s1881_s13 = int_to_ptr.vmem [resolvable:$false] %s1880_s13 }
  0x1b   : > { %s1882_s14 = scalar_lea.vmem %s1881_s13, 2048  ;;  %p1883_p10 = scmp.lt.s32.totalorder %s2016_s18, %s1881_s13 }
  0x1c   : > { %p1878_p5 = pnand %p1876_p4, %p1864_p11  ;;  %p1884_p12 = scmp.lt.s32.totalorder %s1882_s14, %s1875_s11 }
  0x1e   : > { %p1879_p6 = pneg %p1878_p5  ;;  %p1885_p9 = por %p1884_p12, %p1883_p10 }
  0x20   : > { %p1886_p7 = pnand %p1885_p9, %p1879_p6 }
  0x22   : > { %1889 = shalt.err (!%p1886_p7)
}
  0x23   : > { %s1927_s15 = smov 128   ;;  %s1928_s17 = smov 8  }
  0x24   : > { %1826 = dma.hbm_to_vmem [thread:$0]  (!%p2018_p8), %s2014_s16, 1024, %s2016_s18, %s2023_s20, %s1927_s15, %s1927_s15, %s1928_s17  }
  0x25   : > { %p273_p11 = scmp.lt.s32.totalorder %s1924_s27, 5  ;;  %p2316_p13 = scmp.ge.s32.totalorder %s1924_s27, 1 }
  0x27   : > { %p274_p0 = pnand %p2316_p13, %p273_p11 }
  0x28   : > { %s279_s21 = sand.u32 (!%p274_p0), 1, %s1916_s25   ;;  %p2317_p7 = scmp.ne.s32.totalorder (!%p274_p0), %s2314_s10, 0 }
  0x29   : > { %277 = sbr.rel (%p274_p0) target bundleno = 912 (0x390), region = 48  ;;  %s1440_s22 = sshll.u32 (!%p274_p0), %s279_s21, 6 }
  0x2a   : > { %s280_s23 = scalar_lea.sflag (!%p274_p0), [#allocation3], %s279_s21  ;;  %s2048_s24 = scalar_lea.vmem (!%p274_p0), [#allocation2], %s1440_s22 }
  0x2e   : > { %1907 = dma.done.wait (%p2317_p7), %s280_s23, 1024  }
  0x2f   : > { %1909 = vsyncadd (%p2317_p7), %s280_s23, 4294966272  ;;  %p324_p9 = scmp.lt.s32.totalorder %s1988_s28, 3  ;;  %v366_v0 = vld [vmem:[%s2308_s3 + $0x18] sm:$0xff]  ;;  %v365_v2 = vld [vmem:[%s2308_s3 + $0x10] sm:$0xff]  ;;  %vm367_vm0 = vcmask 261120   ;;  %vm606_vm1 = vcmask 523264  }
  0x30   : > { %v500_v1 = vld [vmem:[%s2309_s4 + $0x18] sm:$0xff]  ;;  %1629 = vmatprep.subr.mxu0 %v366_v0  ;;  %v499_v3 = vld [vmem:[%s2309_s4 + $0x10] sm:$0xff]  ;;  %v364_v4 = vld [vmem:[%s2308_s3 + $0x8] sm:$0xff]  ;;  %vm1333_vm2 = vcmask 130048  }
  0x31   : > { %s2323_s28 = smov (!%p324_p9, %s1988_s28), 3  ;;  %1649 = vmatprep.subr.mxu1 %v500_v1  ;;  %1630 = vmatpush3.msra.mxu0 %v366_v0  ;;  %v498_v5 = vld [vmem:[%s2309_s4 + $0x8] sm:$0xff]  ;;  %v363_v6 = vld [vmem:[%s2308_s3] sm:$0xff]  ;;  %v2135_v36 = vld [vmem:[%s2048_s24 + $0x10] sm:$0xff] }
  0x32   : > { %s2056_s16 = sshll.u32 %s2323_s28, 6  ;;  %1650 = vmatpush3.msra.mxu1 %v500_v1  ;;  %1631 = vmatprep.subr.mxu0 %v365_v2  ;;  %v497_v7 = vld [vmem:[%s2309_s4] sm:$0xff]  ;;  %v2129_v34 = vld [vmem:[%s2048_s24 + $0x8] sm:$0xff]  ;;  %v876_v38 = vld [vmem:[%s2310_s5 + $0x18] sm:$0xff] }
  0x33   : > { %s2080_s21 = scalar_lea.vmem %s2305_s0, %s2056_s16  ;;  %1651 = vmatprep.subr.mxu1 %v499_v3  ;;  %1632 = vmatpush3.msra.mxu0 %v365_v2  ;;  %s2116_s30 = scalar_lea.vmem %s2306_s1, %s2056_s16  ;;  %v2119_v16 = vld [vmem:[%s2048_s24] sm:$0xff]  ;;  %v1009_v39 = vld [vmem:[%s2311_s6 + $0x18] sm:$0xff]  ;;  %v875_v44 = vld [vmem:[%s2310_s5 + $0x10] sm:$0xff] }
  0x34   : > { %1652 = vmatpush3.msra.mxu1 %v499_v3  ;;  %1633 = vmatprep.subr.mxu0 %v364_v4  ;;  %v339_v8 = vld [vmem:[%s2080_s21] sm:$0xff]  ;;  %v340_v9 = vld [vmem:[%s2080_s21 + $0x8] sm:$0xff]  ;;  %v341_v10 = vld [vmem:[%s2080_s21 + $0x10] sm:$0xff]  ;;  %s2274_s8 = scalar_lea.vmem %s2312_s7, %s2056_s16 }
  0x35   : > { %1653 = vmatprep.subr.mxu1 %v498_v5  ;;  %1634 = vmatpush3.msra.mxu0 %v364_v4  ;;  %v342_v11 = vld [vmem:[%s2080_s21 + $0x18] sm:$0xff]  ;;  %v343_v12 = vld [vmem:[%s2080_s21 + $0x20] sm:$0xff]  ;;  %v344_v13 = vld [vmem:[%s2080_s21 + $0x28] sm:$0xff] }
  0x36   : > { %1654 = vmatpush3.msra.mxu1 %v498_v5  ;;  %1635 = vmatprep.subr.mxu0 %v363_v6  ;;  %v345_v14 = vld [vmem:[%s2080_s21 + $0x30] sm:$0xff]  ;;  %v346_v15 = vld [vmem:[%s2080_s21 + $0x38] sm:$0xff]  ;;  %v2122_v17 = vld [vmem:[%s2116_s30] sm:$0xff] }
  0x37   : > { %1655 = vmatprep.subr.mxu1 %v497_v7  ;;  %1636 = vmatpush3.msra.mxu0 %v363_v6  ;;  %v2132_v35 = vld [vmem:[%s2116_s30 + $0x8] sm:$0xff]  ;;  %v2138_v37 = vld [vmem:[%s2116_s30 + $0x10] sm:$0xff]  ;;  %v2155_v40 = vld [vmem:[%s2048_s24 + $0x18] sm:$0xff] }
  0x38   : > { %1637 = vmatprep.mubr.msk.f32.mxu0 %vm367_vm0, %v339_v8  ;;  %1656 = vmatpush3.msra.mxu1 %v497_v7  ;;  %v2158_v41 = vld [vmem:[%s2116_s30 + $0x18] sm:$0xff]  ;;  %v2161_v42 = vld [vmem:[%s2048_s24 + $0x20] sm:$0xff]  ;;  %v1008_v45 = vld [vmem:[%s2311_s6 + $0x10] sm:$0xff] }
  0x39   : > { %1657 = vmatprep.mubr.msk.f32.mxu1 %vm367_vm0, %v339_v8  ;;  %1638 = vmatmul.mubr.msk.f32.vlgmr.msra.gmra.mxu0 %vm367_vm0, %v340_v9  ;;  %v2164_v43 = vld [vmem:[%s2116_s30 + $0x20] sm:$0xff]  ;;  %v2181_v46 = vld [vmem:[%s2048_s24 + $0x28] sm:$0xff]  ;;  %v2187_v48 = vld [vmem:[%s2048_s24 + $0x30] sm:$0xff] }
  0x3a   : > { %1658 = vmatmul.mubr.msk.f32.vlgmr.msra.gmra.mxu1 %vm367_vm0, %v340_v9  ;;  %1640 = vmatprep.mubr.msk.f32.mxu0 %vm367_vm0, %v341_v10  ;;  %v2184_v47 = vld [vmem:[%s2116_s30 + $0x28] sm:$0xff]  ;;  %v2190_v49 = vld [vmem:[%s2116_s30 + $0x30] sm:$0xff]  ;;  %v2201_v50 = vld [vmem:[%s2048_s24 + $0x38] sm:$0xff] }
  0x3b   : > { %1660 = vmatprep.mubr.msk.f32.mxu1 %vm367_vm0, %v341_v10  ;;  %v2204_v51 = vld [vmem:[%s2116_s30 + $0x38] sm:$0xff]  ;;  %v874_v52 = vld [vmem:[%s2310_s5 + $0x8] sm:$0xff]  ;;  %v873_v54 = vld [vmem:[%s2310_s5] sm:$0xff] }
  0x3c   : > { %v1007_v53 = vld [vmem:[%s2311_s6 + $0x8] sm:$0xff]  ;;  %v1006_v55 = vld [vmem:[%s2311_s6] sm:$0xff] }
  0x3d   : > { %1641 = vmatmul.mubr.msk.f32.gmra.mxu0 %vm367_vm0, %v342_v11 }
  0x3e   : > { %1661 = vmatmul.mubr.msk.f32.gmra.mxu1 %vm367_vm0, %v342_v11  ;;  %1643 = vmatprep.mubr.msk.f32.mxu0 %vm367_vm0, %v343_v12 }
  0x3f   : > { %1663 = vmatprep.mubr.msk.f32.mxu1 %vm367_vm0, %v343_v12 }
  0x41   : > { %1644 = vmatmul.mubr.msk.f32.gmra.mxu0 %vm367_vm0, %v344_v13 }
  0x42   : > { %1664 = vmatmul.mubr.msk.f32.gmra.mxu1 %vm367_vm0, %v344_v13  ;;  %1646 = vmatprep.mubr.msk.f32.mxu0 %vm367_vm0, %v345_v14 }
  0x43   : > { %1666 = vmatprep.mubr.msk.f32.mxu1 %vm367_vm0, %v345_v14 }
  0x45   : > { %1647 = vmatmul.mubr.msk.f32.gmra.mxu0 %vm367_vm0, %v346_v15 }
  0x46   : > { %1667 = vmatmul.mubr.msk.f32.gmra.mxu1 %vm367_vm0, %v346_v15  ;;  %1685 = vmatprep.mubr.msk.f32.mxu0 %vm606_vm1, %v2119_v16 }
  0x47   : > { %1713 = vmatprep.mubr.msk.f32.mxu1 %vm606_vm1, %v2122_v17 }
  0xf9   : > { %v1639_v18 = vpop.f32.mrf.mxu0 }
  0xfa   : > { %v1659_v19 = vpop.f32.mrf.mxu1 }
  0xfb   : > { %v458_v20 = vpop.f32.mrf.mxu0 }
  0xfc   : > { %v567_v21 = vpop.f32.mrf.mxu1 }
  0xfd   : > { %v1642_v22 = vpop.f32.mrf.mxu0 }
  0xfe   : > { %v1662_v23 = vpop.f32.mrf.mxu1 }
  0xff   : > { %v468_v24 = vpop.f32.mrf.mxu0 }
 0x100   : > { %v577_v25 = vpop.f32.mrf.mxu1 }
 0x101   : > { %v1645_v26 = vpop.f32.mrf.mxu0 }
 0x102   : > { %v1665_v27 = vpop.f32.mrf.mxu1 }
 0x103   : > { %v478_v28 = vpop.f32.mrf.mxu0 }
 0x104   : > { %v587_v29 = vpop.f32.mrf.mxu1 }
 0x105   : > { %v1648_v30 = vpop.f32.mrf.mxu0 }
 0x106   : > { %v1668_v31 = vpop.f32.mrf.mxu1  ;;  %1697 = vmatprep.subr.mxu1 %v1648_v30 }
 0x107   : > { %1669 = vmatprep.subr.mxu0 %v1668_v31  ;;  %v488_v32 = vpop.f32.mrf.mxu0  ;;  %1698 = vmatpush3.msra.mxu1 %v1648_v30 }
 0x108   : > { %v597_v33 = vpop.f32.mrf.mxu1  ;;  %1670 = vmatpush3.msra.mxu0 %v1668_v31  ;;  %1699 = vmatprep.subr.mxu1 %v488_v32 }
 0x109   : > { %1671 = vmatprep.subr.mxu0 %v597_v33  ;;  %1700 = vmatpush3.msra.mxu1 %v488_v32 }
 0x10a   : > { %1672 = vmatpush3.msra.mxu0 %v597_v33  ;;  %1701 = vmatprep.subr.mxu1 %v1645_v26 }
 0x10b   : > { %1673 = vmatprep.subr.mxu0 %v1665_v27  ;;  %1702 = vmatpush3.msra.mxu1 %v1645_v26 }
 0x10c   : > { %1674 = vmatpush3.msra.mxu0 %v1665_v27  ;;  %1703 = vmatprep.subr.mxu1 %v478_v28 }
 0x10d   : > { %1675 = vmatprep.subr.mxu0 %v587_v29  ;;  %1704 = vmatpush3.msra.mxu1 %v478_v28 }
 0x10e   : > { %1676 = vmatpush3.msra.mxu0 %v587_v29  ;;  %1705 = vmatprep.subr.mxu1 %v1642_v22 }
 0x10f   : > { %1677 = vmatprep.subr.mxu0 %v1662_v23  ;;  %1706 = vmatpush3.msra.mxu1 %v1642_v22 }
 0x110   : > { %1678 = vmatpush3.msra.mxu0 %v1662_v23  ;;  %1707 = vmatprep.subr.mxu1 %v468_v24 }
 0x111   : > { %1679 = vmatprep.subr.mxu0 %v577_v25  ;;  %1708 = vmatpush3.msra.mxu1 %v468_v24 }
 0x112   : > { %1680 = vmatpush3.msra.mxu0 %v577_v25  ;;  %1709 = vmatprep.subr.mxu1 %v1639_v18 }
 0x113   : > { %1681 = vmatprep.subr.mxu0 %v1659_v19  ;;  %1710 = vmatpush3.msra.mxu1 %v1639_v18 }
 0x114   : > { %1682 = vmatpush3.msra.mxu0 %v1659_v19  ;;  %1711 = vmatprep.subr.mxu1 %v458_v20 }
 0x115   : > { %1683 = vmatprep.subr.mxu0 %v567_v21  ;;  %1712 = vmatpush3.msra.mxu1 %v458_v20 }
 0x116   : > { %1684 = vmatpush3.msra.mxu0 %v567_v21  ;;  %1714 = vmatmul.mubr.msk.f32.vlgmr.msra.gmra.mxu1 %vm606_vm1, %v2132_v35 }
 0x117   : > { %1686 = vmatmul.mubr.msk.f32.vlgmr.msra.gmra.mxu0 %vm606_vm1, %v2129_v34  ;;  %1716 = vmatprep.mubr.msk.f32.mxu1 %vm606_vm1, %v2138_v37 }
 0x118   : > { %1688 = vmatprep.mubr.msk.f32.mxu0 %vm606_vm1, %v2135_v36  ;;  %1725 = vmatprep.subr.mxu0 %v876_v38 }
 0x119   : > { %1745 = vmatprep.subr.mxu1 %v1009_v39  ;;  %1726 = vmatpush3.msra.mxu0 %v876_v38 }
 0x11a   : > { %1746 = vmatpush3.msra.mxu1 %v1009_v39  ;;  %1727 = vmatprep.subr.mxu0 %v875_v44 }
 0x11b   : > { %1689 = vmatmul.mubr.msk.f32.gmra.mxu0 %vm606_vm1, %v2155_v40  ;;  %1717 = vmatmul.mubr.msk.f32.gmra.mxu1 %vm606_vm1, %v2158_v41 }
 0x11c   : > { %1691 = vmatprep.mubr.msk.f32.mxu0 %vm606_vm1, %v2161_v42  ;;  %1719 = vmatprep.mubr.msk.f32.mxu1 %vm606_vm1, %v2164_v43 }
 0x11d   : > { %1747 = vmatprep.subr.mxu1 %v1008_v45  ;;  %1728 = vmatpush3.msra.mxu0 %v875_v44 }
 0x11e   : > { %1748 = vmatpush3.msra.mxu1 %v1008_v45  ;;  %1729 = vmatprep.subr.mxu0 %v874_v52 }
 0x11f   : > { %1692 = vmatmul.mubr.msk.f32.gmra.mxu0 %vm606_vm1, %v2181_v46  ;;  %1720 = vmatmul.mubr.msk.f32.gmra.mxu1 %vm606_vm1, %v2184_v47 }
 0x120   : > { %1694 = vmatprep.mubr.msk.f32.mxu0 %vm606_vm1, %v2187_v48  ;;  %1722 = vmatprep.mubr.msk.f32.mxu1 %vm606_vm1, %v2190_v49 }
 0x121   : > { %1749 = vmatprep.subr.mxu1 %v1007_v53  ;;  %1730 = vmatpush3.msra.mxu0 %v874_v52 }
 0x122   : > { %1750 = vmatpush3.msra.mxu1 %v1007_v53  ;;  %1731 = vmatprep.subr.mxu0 %v873_v54 }
 0x123   : > { %1695 = vmatmul.mubr.msk.f32.gmra.mxu0 %vm606_vm1, %v2201_v50  ;;  %1723 = vmatmul.mubr.msk.f32.gmra.mxu1 %vm606_vm1, %v2204_v51 }
 0x124   : > { %1751 = vmatprep.subr.mxu1 %v1006_v55  ;;  %1732 = vmatpush3.msra.mxu0 %v873_v54 }
 0x125   : > { %1752 = vmatpush3.msra.mxu1 %v1006_v55 }
 0x1d6   : > { %v1715_v57 = vpop.f32.mrf.mxu1 }
 0x1d7   : > { %v1687_v56 = vpop.f32.mrf.mxu0 }
 0x1d8   : > { %v832_v58 = vadd.f32 %v1715_v57, %v1687_v56  ;;  %v826_v60 = vpop.f32.mrf.mxu1 }
 0x1d9   : > { %v697_v59 = vpop.f32.mrf.mxu0 }
 0x1da   : > { %v827_v61 = vadd.f32 %v826_v60, %v697_v59  ;;  %v866_v1 = vmax.f32 %v832_v58, 0.0 }
 0x1db   : > { %v1690_v62 = vpop.f32.mrf.mxu0  ;;  %v1718_v63 = vpop.f32.mrf.mxu1 }
 0x1dc   : > { %v865_v0 = vmax.f32 %v827_v61, 0.0  ;;  %v842_v2 = vadd.f32 %v1718_v63, %v1690_v62 }
 0x1dd   : > { %v707_v3 = vpop.f32.mrf.mxu0  ;;  %v836_v4 = vpop.f32.mrf.mxu1 }
 0x1de   : > { %v837_v5 = vadd.f32 %v836_v4, %v707_v3  ;;  %1733 = vmatprep.mubr.msk.f32.mxu0 %vm367_vm0, %v865_v0  ;;  %1753 = vmatprep.mubr.msk.f32.mxu1 %vm367_vm0, %v865_v0  ;;  %v868_v9 = vmax.f32 %v842_v2, 0.0 }
 0x1df   : > { %v1693_v6 = vpop.f32.mrf.mxu0  ;;  %v1721_v7 = vpop.f32.mrf.mxu1  ;;  %1734 = vmatmul.mubr.msk.f32.vlgmr.msra.gmra.mxu0 %vm367_vm0, %v866_v1  ;;  %1754 = vmatmul.mubr.msk.f32.vlgmr.msra.gmra.mxu1 %vm367_vm0, %v866_v1 }
 0x1e0   : > { %v867_v8 = vmax.f32 %v837_v5, 0.0  ;;  %v852_v10 = vadd.f32 %v1721_v7, %v1693_v6 }
 0x1e1   : > { %v717_v11 = vpop.f32.mrf.mxu0  ;;  %v846_v12 = vpop.f32.mrf.mxu1 }
 0x1e2   : > { %v847_v13 = vadd.f32 %v846_v12, %v717_v11  ;;  %1736 = vmatprep.mubr.msk.f32.mxu0 %vm367_vm0, %v867_v8  ;;  %1756 = vmatprep.mubr.msk.f32.mxu1 %vm367_vm0, %v867_v8  ;;  %v870_v19 = vmax.f32 %v852_v10, 0.0 }
 0x1e3   : > { %v1696_v14 = vpop.f32.mrf.mxu0  ;;  %v1724_v15 = vpop.f32.mrf.mxu1  ;;  %1737 = vmatmul.mubr.msk.f32.gmra.mxu0 %vm367_vm0, %v868_v9  ;;  %1757 = vmatmul.mubr.msk.f32.gmra.mxu1 %vm367_vm0, %v868_v9 }
 0x1e4   : > { %v869_v18 = vmax.f32 %v847_v13, 0.0  ;;  %v862_v20 = vadd.f32 %v1724_v15, %v1696_v14 }
 0x1e5   : > { %v727_v21 = vpop.f32.mrf.mxu0  ;;  %v856_v22 = vpop.f32.mrf.mxu1 }
 0x1e6   : > { %v857_v23 = vadd.f32 %v856_v22, %v727_v21  ;;  %1739 = vmatprep.mubr.msk.f32.mxu0 %vm367_vm0, %v869_v18  ;;  %1759 = vmatprep.mubr.msk.f32.mxu1 %vm367_vm0, %v869_v18  ;;  %v872_v25 = vmax.f32 %v862_v20, 0.0 }
 0x1e7   : > { %1740 = vmatmul.mubr.msk.f32.gmra.mxu0 %vm367_vm0, %v870_v19  ;;  %1760 = vmatmul.mubr.msk.f32.gmra.mxu1 %vm367_vm0, %v870_v19 }
 0x1e8   : > { %v871_v24 = vmax.f32 %v857_v23, 0.0 }
 0x1ea   : > { %1742 = vmatprep.mubr.msk.f32.mxu0 %vm367_vm0, %v871_v24  ;;  %1762 = vmatprep.mubr.msk.f32.mxu1 %vm367_vm0, %v871_v24 }
 0x1eb   : > { %1743 = vmatmul.mubr.msk.f32.gmra.mxu0 %vm367_vm0, %v872_v25  ;;  %1763 = vmatmul.mubr.msk.f32.gmra.mxu1 %vm367_vm0, %v872_v25 }
 0x1ec   : > { %1781 = vmatprep.mubr.msk.f32.mxu0 %vm606_vm1, %v2119_v16  ;;  %1809 = vmatprep.mubr.msk.f32.mxu1 %vm606_vm1, %v2122_v17 }
 0x29f   : > { %v1735_v26 = vpop.f32.mrf.mxu0  ;;  %v1755_v27 = vpop.f32.mrf.mxu1 }
 0x2a1   : > { %v967_v28 = vpop.f32.mrf.mxu0  ;;  %v1076_v29 = vpop.f32.mrf.mxu1 }
 0x2a3   : > { %v1738_v30 = vpop.f32.mrf.mxu0  ;;  %v1758_v31 = vpop.f32.mrf.mxu1 }
 0x2a5   : > { %v977_v32 = vpop.f32.mrf.mxu0  ;;  %v1086_v33 = vpop.f32.mrf.mxu1 }
 0x2a7   : > { %v1741_v38 = vpop.f32.mrf.mxu0  ;;  %v1761_v39 = vpop.f32.mrf.mxu1 }
 0x2a9   : > { %v987_v44 = vpop.f32.mrf.mxu0  ;;  %v1096_v45 = vpop.f32.mrf.mxu1 }
 0x2ab   : > { %v1744_v52 = vpop.f32.mrf.mxu0  ;;  %v1764_v53 = vpop.f32.mrf.mxu1 }
 0x2ac   : > { %1765 = vmatprep.subr.mxu0 %v1764_v53  ;;  %1793 = vmatprep.subr.mxu1 %v1744_v52 }
 0x2ad   : > { %v997_v16 = vpop.f32.mrf.mxu0  ;;  %v1106_v54 = vpop.f32.mrf.mxu1  ;;  %1766 = vmatpush3.msra.mxu0 %v1764_v53  ;;  %1794 = vmatpush3.msra.mxu1 %v1744_v52 }
 0x2ae   : > { %1767 = vmatprep.subr.mxu0 %v1106_v54  ;;  %1795 = vmatprep.subr.mxu1 %v997_v16 }
 0x2af   : > { %1768 = vmatpush3.msra.mxu0 %v1106_v54  ;;  %1796 = vmatpush3.msra.mxu1 %v997_v16 }
 0x2b0   : > { %1769 = vmatprep.subr.mxu0 %v1761_v39  ;;  %1797 = vmatprep.subr.mxu1 %v1741_v38 }
 0x2b1   : > { %1770 = vmatpush3.msra.mxu0 %v1761_v39  ;;  %1798 = vmatpush3.msra.mxu1 %v1741_v38 }
 0x2b2   : > { %1771 = vmatprep.subr.mxu0 %v1096_v45  ;;  %1799 = vmatprep.subr.mxu1 %v987_v44 }
 0x2b3   : > { %1772 = vmatpush3.msra.mxu0 %v1096_v45  ;;  %1800 = vmatpush3.msra.mxu1 %v987_v44 }
 0x2b4   : > { %1773 = vmatprep.subr.mxu0 %v1758_v31  ;;  %1801 = vmatprep.subr.mxu1 %v1738_v30 }
 0x2b5   : > { %1774 = vmatpush3.msra.mxu0 %v1758_v31  ;;  %1802 = vmatpush3.msra.mxu1 %v1738_v30 }
 0x2b6   : > { %1775 = vmatprep.subr.mxu0 %v1086_v33  ;;  %1803 = vmatprep.subr.mxu1 %v977_v32 }
 0x2b7   : > { %1776 = vmatpush3.msra.mxu0 %v1086_v33  ;;  %1804 = vmatpush3.msra.mxu1 %v977_v32 }
 0x2b8   : > { %1777 = vmatprep.subr.mxu0 %v1755_v27  ;;  %1805 = vmatprep.subr.mxu1 %v1735_v26 }
 0x2b9   : > { %1778 = vmatpush3.msra.mxu0 %v1755_v27  ;;  %1806 = vmatpush3.msra.mxu1 %v1735_v26 }
 0x2ba   : > { %1779 = vmatprep.subr.mxu0 %v1076_v29  ;;  %1807 = vmatprep.subr.mxu1 %v967_v28 }
 0x2bb   : > { %1780 = vmatpush3.msra.mxu0 %v1076_v29  ;;  %1808 = vmatpush3.msra.mxu1 %v967_v28 }
 0x2bc   : > { %1782 = vmatmul.mubr.msk.f32.vlgmr.msra.gmra.mxu0 %vm606_vm1, %v2129_v34  ;;  %1810 = vmatmul.mubr.msk.f32.vlgmr.msra.gmra.mxu1 %vm606_vm1, %v2132_v35 }
 0x2bd   : > { %1784 = vmatprep.mubr.msk.f32.mxu0 %vm606_vm1, %v2135_v36  ;;  %1812 = vmatprep.mubr.msk.f32.mxu1 %vm606_vm1, %v2138_v37 }
 0x2c0   : > { %1785 = vmatmul.mubr.msk.f32.gmra.mxu0 %vm606_vm1, %v2155_v40  ;;  %1813 = vmatmul.mubr.msk.f32.gmra.mxu1 %vm606_vm1, %v2158_v41 }
 0x2c1   : > { %1787 = vmatprep.mubr.msk.f32.mxu0 %vm606_vm1, %v2161_v42  ;;  %1815 = vmatprep.mubr.msk.f32.mxu1 %vm606_vm1, %v2164_v43 }
 0x2c4   : > { %1788 = vmatmul.mubr.msk.f32.gmra.mxu0 %vm606_vm1, %v2181_v46  ;;  %1816 = vmatmul.mubr.msk.f32.gmra.mxu1 %vm606_vm1, %v2184_v47 }
 0x2c5   : > { %1790 = vmatprep.mubr.msk.f32.mxu0 %vm606_vm1, %v2187_v48  ;;  %1818 = vmatprep.mubr.msk.f32.mxu1 %vm606_vm1, %v2190_v49 }
 0x2c8   : > { %1791 = vmatmul.mubr.msk.f32.gmra.mxu0 %vm606_vm1, %v2201_v50  ;;  %1819 = vmatmul.mubr.msk.f32.gmra.mxu1 %vm606_vm1, %v2204_v51 }
 0x37c   : > { %v1783_v17 = vpop.f32.mrf.mxu0  ;;  %v1811_v34 = vpop.f32.mrf.mxu1 }
 0x37d   : > { %v1292_v35 = vadd.f32 %v1811_v34, %v1783_v17 }
 0x37e   : > { %v1181_v36 = vpop.f32.mrf.mxu0  ;;  %v1286_v37 = vpop.f32.mrf.mxu1 }
 0x37f   : > { %v1326_v40 = vmax.f32 %v1292_v35, 0.0  ;;  %v1287_v41 = vadd.f32 %v1286_v37, %v1181_v36 }
 0x380   : > { %v1786_v42 = vpop.f32.mrf.mxu0  ;;  %v1814_v43 = vpop.f32.mrf.mxu1 }
 0x381   : > { %1335 = vst.msk [vmem:[%s2274_s8 + $0x8] sm:$0xff] %vm1333_vm2, %v1326_v40  ;;  %v1325_v46 = vmax.f32 %v1287_v41, 0.0  ;;  %v1302_v47 = vadd.f32 %v1814_v43, %v1786_v42 }
 0x382   : > { %v1191_v48 = vpop.f32.mrf.mxu0  ;;  %v1296_v49 = vpop.f32.mrf.mxu1 }
 0x383   : > { %1334 = vst.msk [vmem:[%s2274_s8] sm:$0xff] %vm1333_vm2, %v1325_v46  ;;  %v1328_v50 = vmax.f32 %v1302_v47, 0.0  ;;  %v1297_v51 = vadd.f32 %v1296_v49, %v1191_v48 }
 0x384   : > { %v1789_v55 = vpop.f32.mrf.mxu0  ;;  %v1817_v56 = vpop.f32.mrf.mxu1 }
 0x385   : > { %1337 = vst.msk [vmem:[%s2274_s8 + $0x18] sm:$0xff] %vm1333_vm2, %v1328_v50  ;;  %v1327_v57 = vmax.f32 %v1297_v51, 0.0  ;;  %v1312_v58 = vadd.f32 %v1817_v56, %v1789_v55 }
 0x386   : > { %v1201_v59 = vpop.f32.mrf.mxu0  ;;  %v1306_v60 = vpop.f32.mrf.mxu1 }
 0x387   : > { %1336 = vst.msk [vmem:[%s2274_s8 + $0x10] sm:$0xff] %vm1333_vm2, %v1327_v57  ;;  %v1330_v61 = vmax.f32 %v1312_v58, 0.0  ;;  %v1307_v62 = vadd.f32 %v1306_v60, %v1201_v59 }
 0x388   : > { %v1792_v63 = vpop.f32.mrf.mxu0  ;;  %v1820_v0 = vpop.f32.mrf.mxu1 }
 0x389   : > { %1339 = vst.msk [vmem:[%s2274_s8 + $0x28] sm:$0xff] %vm1333_vm2, %v1330_v61  ;;  %v1329_v1 = vmax.f32 %v1307_v62, 0.0  ;;  %v1322_v2 = vadd.f32 %v1820_v0, %v1792_v63 }
 0x38a   : > { %v1211_v3 = vpop.f32.mrf.mxu0  ;;  %v1316_v4 = vpop.f32.mrf.mxu1 }
 0x38b   : > { %1338 = vst.msk [vmem:[%s2274_s8 + $0x20] sm:$0xff] %vm1333_vm2, %v1329_v1  ;;  %v1332_v5 = vmax.f32 %v1322_v2, 0.0  ;;  %v1317_v6 = vadd.f32 %v1316_v4, %v1211_v3 }
 0x38d   : > { %1341 = vst.msk [vmem:[%s2274_s8 + $0x38] sm:$0xff] %vm1333_vm2, %v1332_v5  ;;  %v1331_v7 = vmax.f32 %v1317_v6, 0.0 }
 0x38f   : > { %1340 = vst.msk [vmem:[%s2274_s8 + $0x30] sm:$0xff] %vm1333_vm2, %v1331_v7 }
 0x390 PF: > { %p17_p8 = scmp.ge.s32.totalorder %s1991_s29, 6   ;;  %s2318_s24 = smov %s1916_s25 }
 0x391   : > { %s2319_s25 = smov %s1920_s26  ;;  %s2320_s26 = smov %s2001_s9 }
 0x392   : > { %s2321_s27 = smov %s1991_s29  ;;  %19 = sbr.rel (!%p17_p8) target bundleno = 3 (0x3), region = 94 }
 0x397   :  { %1363 = vsyncpa [#allocation3], 1 }
 0x398   :  { %1365 = vsyncpa [#allocation3 + $0x1], 1 }

</bundles_post_ra>
